<compile_context>
chip_gen: v5e
topology: v5e:2x2
jax: 0.10.0
libtpu: 0.0.40
codegen_flags: <defaults>
</compile_context>

<pallas_src>
import functools

import jax
import jax.numpy as jnp
from jax.experimental import pallas as pl
from jax.experimental.pallas import tpu as pltpu


def _round_up(x: int, m: int) -> int:
    return ((x + m - 1) // m) * m


def _keypoint_loss_kernel(p_ref, g_ref, m_ref, area_ref, invs_ref, out_ref,
                          acc_ref, *, two_k: int, k_float: float, inv_nk: float):
    pid = pl.program_id(0)

    @pl.when(pid == 0)
    def _init():
        acc_ref[...] = jnp.zeros_like(acc_ref)

    # (T, 2K) interleaved [x0, y0, x1, y1, ...] planes.
    diff = p_ref[...] - g_ref[...]
    inv_area = pl.reciprocal(area_ref[...] + jnp.float32(1e-9), approx=False)  # (T, 1)
    sq = diff * diff * invs_ref[...] * inv_area                                # (T, 2K)

    # Pair-sum x/y before the exp: e_i = sq[:, 2i] + sq[:, 2i+1] lands on even
    # lane 2i of `pair`.  Odd lanes mix neighbouring keypoints, but the
    # zero-interleaved mask (exact 0 on every odd lane) removes them below.
    pair = sq[:, : two_k - 1] + sq[:, 1:two_k]                                 # (T, 2K-1)

    m = m_ref[...]                                                             # (T, 2K)
    t = (1.0 - jnp.exp(-pair)) * m[:, : two_k - 1]                             # (T, 2K-1)

    # Reduce over keypoints first, then apply the per-row loss factor.
    row_loss = jnp.sum(t, axis=1, keepdims=True)                               # (T, 1)
    cnt = jnp.sum((m != 0).astype(jnp.float32), axis=1, keepdims=True)         # (T, 1)
    factor = jnp.float32(k_float) * pl.reciprocal(cnt + jnp.float32(1e-9),
                                                  approx=False)                # (T, 1)

    acc_ref[...] += jnp.sum(factor * row_loss)

    @pl.when(pid == pl.num_programs(0) - 1)
    def _finalize():
        # True-N mean divisor (static shape), independent of row padding/tiling.
        out_ref[0, 0] = jnp.sum(acc_ref[...]) * jnp.float32(inv_nk)


def keypoint_loss(pred_kpts, gt_kpts, kpt_mask, area, sigmas, *, tile_n: int = 1024):
    """pred_kpts/gt_kpts: (N, K, 2); kpt_mask: (N, K); area: (N, 1); sigmas: (K,)."""
    n, k = kpt_mask.shape
    two_k = 2 * k
    f32 = jnp.float32

    # Zero-copy: (N, K, 2) is row-major contiguous, so reshape keeps x/y
    # interleaved on the lane axis with no HBM traffic.
    p2 = pred_kpts.astype(f32).reshape(n, two_k)
    g2 = gt_kpts.astype(f32).reshape(n, two_k)

    # Mask zero-interleaved to (N, 2K): value on the x lane, 0 on the y lane.
    # Only wrapper data movement left (N*K -> 2*N*K floats).
    mask = kpt_mask.astype(f32)
    m2 = jnp.stack([mask, jnp.zeros_like(mask)], axis=-1).reshape(n, two_k)

    area2 = area.reshape(n, 1).astype(f32)

    # 1 / ((2*sigma_i)^2 * 2), repeated onto both the x and y lanes.
    inv_sig = 1.0 / ((2.0 * sigmas.astype(f32)) ** 2 * 2.0)                    # (K,)
    inv_sig2 = jnp.repeat(inv_sig, 2).reshape(1, two_k)                        # (1, 2K)

    # Row tiling: tile must be a multiple of 8 (sublane granule); rows are
    # zero-padded to a multiple of tile_n.  Zero rows contribute exactly 0.
    tile_n = max(8, min(_round_up(tile_n, 8), _round_up(n, 8)))
    n_pad = _round_up(n, tile_n)
    if n_pad != n:
        row_pad = ((0, n_pad - n), (0, 0))
        p2 = jnp.pad(p2, row_pad)
        g2 = jnp.pad(g2, row_pad)
        m2 = jnp.pad(m2, row_pad)
        area2 = jnp.pad(area2, row_pad)

    grid = (n_pad // tile_n,)
    kernel = functools.partial(_keypoint_loss_kernel, two_k=two_k,
                               k_float=float(k), inv_nk=1.0 / float(n * k))

    out = pl.pallas_call(
        kernel,
        out_shape=jax.ShapeDtypeStruct((1, 1), jnp.float32),
        grid=grid,
        in_specs=[
            pl.BlockSpec((tile_n, two_k), lambda i: (i, 0)),   # pred  (N, 2K)
            pl.BlockSpec((tile_n, two_k), lambda i: (i, 0)),   # gt    (N, 2K)
            pl.BlockSpec((tile_n, two_k), lambda i: (i, 0)),   # mask  (N, 2K)
            pl.BlockSpec((tile_n, 1), lambda i: (i, 0)),       # area  (N, 1)
            pl.BlockSpec((1, two_k), lambda i: (0, 0)),        # inv_sig (1, 2K), resident
        ],
        out_specs=pl.BlockSpec(memory_space=pltpu.MemorySpace.SMEM),
        scratch_shapes=[pltpu.VMEM((1, 1), jnp.float32)],      # running sum
        compiler_params=pltpu.CompilerParams(
            dimension_semantics=("arbitrary",)),
    )(p2, g2, m2, area2, inv_sig2)
    return out[0, 0]


def keypoint_loss_ref(pred_kpts, gt_kpts, kpt_mask, area, sigmas):
    """Pure-JAX reference mirroring the PyTorch forward (for sanity check)."""
    d = (pred_kpts[..., 0] - gt_kpts[..., 0]) ** 2 + (pred_kpts[..., 1] - gt_kpts[..., 1]) ** 2
    klf = kpt_mask.shape[1] / (jnp.sum(kpt_mask != 0, axis=1) + 1e-9)
    e = d / ((2 * sigmas) ** 2 * (area + 1e-9) * 2)
    return jnp.mean(klf.reshape(-1, 1) * ((1 - jnp.exp(-e)) * kpt_mask))


if __name__ == "__main__":
    N, K = 8, 17  # 8 instances, 17 COCO-style keypoints

    # deterministic "parameters": sigmas (module __init__ argument), shape (K,)
    oks_sigmas = jnp.array(
        [0.26, 0.25, 0.25, 0.35, 0.35, 0.79, 0.79, 0.72, 0.72, 0.62,
         0.62, 1.07, 1.07, 0.87, 0.87, 0.89, 0.89], dtype=jnp.float32) / 10.0

    key = jax.random.PRNGKey(0)
    k1, k2, k3, k4 = jax.random.split(key, 4)
    pred_kpts = jax.random.uniform(k1, (N, K, 2), jnp.float32) * 32.0
    gt_kpts = jax.random.uniform(k2, (N, K, 2), jnp.float32) * 32.0
    kpt_mask = (jax.random.uniform(k3, (N, K), jnp.float32) > 0.3).astype(jnp.float32)
    area = jax.random.uniform(k4, (N, 1), jnp.float32) * 100.0 + 10.0

    loss = keypoint_loss(pred_kpts, gt_kpts, kpt_mask, area, oks_sigmas)
    loss = jax.block_until_ready(loss)

    ref = keypoint_loss_ref(pred_kpts, gt_kpts, kpt_mask, area, oks_sigmas)
    assert jnp.allclose(loss, ref, rtol=2e-5, atol=1e-6), (loss, ref)

    print("KERNEL_OK")
</pallas_src>

<mosaic_0001>
module attributes {stable_mosaic.version = 11 : i64} {
  func.func @_keypoint_loss_kernel(%arg0: i32, %arg1: memref<8x34xf32, #tpu.memory_space<vmem>>, %arg2: memref<8x34xf32, #tpu.memory_space<vmem>>, %arg3: memref<8x34xf32, #tpu.memory_space<vmem>>, %arg4: memref<8x1xf32, #tpu.memory_space<vmem>>, %arg5: memref<1x34xf32, #tpu.memory_space<vmem>>, %arg6: memref<1x1xf32, #tpu.memory_space<smem>>, %arg7: memref<1x1xf32, #tpu.memory_space<vmem>>) attributes {dimension_semantics = [#tpu.dimension_semantics<arbitrary>], iteration_bounds = array<i64: 1>, scalar_prefetch = 0 : i64, scratch_operands = 1 : i64, tpu.core_type = #tpu.core_type<tc>, window_params = [{transform_indices = @transform_0, window_bounds = array<i64: 8, 34>}, {transform_indices = @transform_1, window_bounds = array<i64: 8, 34>}, {transform_indices = @transform_2, window_bounds = array<i64: 8, 34>}, {transform_indices = @transform_3, window_bounds = array<i64: 8, 1>}, {pipeline_mode = #tpu.pipeline_mode<synchronous>, transform_indices = @transform_4, window_bounds = array<i64: 1, 34>}, {transform_indices = @transform_5, window_bounds = array<i64: 1, 1>}]} {
    %c0_i32 = arith.constant 0 : i32
    %0 = arith.cmpi eq, %arg0, %c0_i32 : i32
    %1 = arith.extui %0 : i1 to i32
    %c0_i32_0 = arith.constant 0 : i32
    %2 = arith.cmpi ne, %1, %c0_i32_0 : i32
    scf.if %2 {
      %cst_24 = arith.constant 0.000000e+00 : f32
      %52 = vector.broadcast %cst_24 : f32 to vector<1x1xf32>
      %c0_25 = arith.constant 0 : index
      %c0_26 = arith.constant 0 : index
      %53 = vector.load %arg7[%c0_25, %c0_26] : memref<1x1xf32, #tpu.memory_space<vmem>>, vector<1x1xf32>
      tpu.vector_store %arg7[%c0_25, %c0_26], %52 {strides = array<i32>} : memref<1x1xf32, #tpu.memory_space<vmem>>, vector<1x1xf32>,
    } else {
    }
    %c0 = arith.constant 0 : index
    %c0_1 = arith.constant 0 : index
    %3 = vector.load %arg1[%c0, %c0_1] : memref<8x34xf32, #tpu.memory_space<vmem>>, vector<8x34xf32>
    %c0_2 = arith.constant 0 : index
    %c0_3 = arith.constant 0 : index
    %4 = vector.load %arg2[%c0_2, %c0_3] : memref<8x34xf32, #tpu.memory_space<vmem>>, vector<8x34xf32>
    %5 = arith.subf %3, %4 : vector<8x34xf32>
    %c0_4 = arith.constant 0 : index
    %c0_5 = arith.constant 0 : index
    %6 = vector.load %arg4[%c0_4, %c0_5] : memref<8x1xf32, #tpu.memory_space<vmem>>, vector<8x1xf32>
    %cst = arith.constant 9.99999971E-10 : f32
    %7 = vector.broadcast %cst : f32 to vector<8x1xf32>
    %8 = arith.addf %6, %7 : vector<8x1xf32>
    %9 = tpu.reciprocal %8 : vector<8x1xf32> -> vector<8x1xf32>
    %10 = arith.mulf %5, %5 : vector<8x34xf32>
    %c0_6 = arith.constant 0 : index
    %c0_7 = arith.constant 0 : index
    %11 = vector.load %arg5[%c0_6, %c0_7] : memref<1x34xf32, #tpu.memory_space<vmem>>, vector<1x34xf32>
    %12 = vector.broadcast %11 : vector<1x34xf32> to vector<8x34xf32>
    %13 = arith.mulf %10, %12 : vector<8x34xf32>
    %14 = vector.broadcast %9 : vector<8x1xf32> to vector<8x34xf32>
    %15 = arith.mulf %13, %14 : vector<8x34xf32>
    %16 = vector.extract_strided_slice %15 {offsets = [0, 0], sizes = [8, 33], strides = [1, 1]} : vector<8x34xf32> to vector<8x33xf32>
    %17 = vector.extract_strided_slice %15 {offsets = [0, 1], sizes = [8, 33], strides = [1, 1]} : vector<8x34xf32> to vector<8x33xf32>
    %18 = arith.addf %16, %17 : vector<8x33xf32>
    %c0_8 = arith.constant 0 : index
    %c0_9 = arith.constant 0 : index
    %19 = vector.load %arg3[%c0_8, %c0_9] : memref<8x34xf32, #tpu.memory_space<vmem>>, vector<8x34xf32>
    %cst_10 = arith.constant 0.000000e+00 : f32
    %20 = vector.broadcast %cst_10 : f32 to vector<8x33xf32>
    %21 = arith.subf %20, %18 : vector<8x33xf32>
    %22 = math.exp %21 : vector<8x33xf32>
    %cst_11 = arith.constant 1.000000e+00 : f32
    %23 = vector.broadcast %cst_11 : f32 to vector<8x33xf32>
    %24 = arith.subf %23, %22 : vector<8x33xf32>
    %25 = vector.extract_strided_slice %19 {offsets = [0, 0], sizes = [8, 33], strides = [1, 1]} : vector<8x34xf32> to vector<8x33xf32>
    %26 = arith.mulf %24, %25 : vector<8x33xf32>
    %cst_12 = arith.constant dense<0.000000e+00> : vector<8xf32>
    %27 = vector.multi_reduction <add>, %26, %cst_12 [1] : vector<8x33xf32> to vector<8xf32>
    %28 = vector.shape_cast %27 : vector<8xf32> to vector<8x1xf32>
    %cst_13 = arith.constant 0.000000e+00 : f32
    %29 = vector.broadcast %cst_13 : f32 to vector<8x34xf32>
    %30 = arith.cmpf one, %19, %29 : vector<8x34xf32>
    %31 = arith.extui %30 : vector<8x34xi1> to vector<8x34xi32>
    %32 = arith.sitofp %31 : vector<8x34xi32> to vector<8x34xf32>
    %cst_14 = arith.constant dense<0.000000e+00> : vector<8xf32>
    %33 = vector.multi_reduction <add>, %32, %cst_14 [1] : vector<8x34xf32> to vector<8xf32>
    %34 = vector.shape_cast %33 : vector<8xf32> to vector<8x1xf32>
    %cst_15 = arith.constant 9.99999971E-10 : f32
    %35 = vector.broadcast %cst_15 : f32 to vector<8x1xf32>
    %36 = arith.addf %34, %35 : vector<8x1xf32>
    %37 = tpu.reciprocal %36 : vector<8x1xf32> -> vector<8x1xf32>
    %cst_16 = arith.constant 1.700000e+01 : f32
    %38 = vector.broadcast %cst_16 : f32 to vector<8x1xf32>
    %39 = arith.mulf %38, %37 : vector<8x1xf32>
    %c0_17 = arith.constant 0 : index
    %c0_18 = arith.constant 0 : index
    %40 = vector.load %arg7[%c0_17, %c0_18] : memref<1x1xf32, #tpu.memory_space<vmem>>, vector<1x1xf32>
    %41 = arith.mulf %39, %28 : vector<8x1xf32>
    %42 = vector.shape_cast %41 : vector<8x1xf32> to vector<1x8x1xf32>
    %cst_19 = arith.constant dense<0.000000e+00> : vector<1xf32>
    %43 = vector.multi_reduction <add>, %42, %cst_19 [1, 2] : vector<1x8x1xf32> to vector<1xf32>
    %44 = vector.shape_cast %43 : vector<1xf32> to vector<1x1x1xf32>
    %45 = vector.extract %44[0, 0, 0] : f32 from vector<1x1x1xf32>
    %46 = vector.broadcast %45 : f32 to vector<1x1xf32>
    %47 = arith.addf %40, %46 : vector<1x1xf32>
    %c0_20 = arith.constant 0 : index
    %c0_21 = arith.constant 0 : index
    %48 = vector.load %arg7[%c0_20, %c0_21] : memref<1x1xf32, #tpu.memory_space<vmem>>, vector<1x1xf32>
    tpu.vector_store %arg7[%c0_20, %c0_21], %47 {strides = array<i32>} : memref<1x1xf32, #tpu.memory_space<vmem>>, vector<1x1xf32>,
    %c0_i32_22 = arith.constant 0 : i32
    %49 = arith.cmpi eq, %arg0, %c0_i32_22 : i32
    %50 = arith.extui %49 : i1 to i32
    %c0_i32_23 = arith.constant 0 : i32
    %51 = arith.cmpi ne, %50, %c0_i32_23 : i32
    scf.if %51 {
      %c0_24 = arith.constant 0 : index
      %c0_25 = arith.constant 0 : index
      %52 = vector.load %arg7[%c0_24, %c0_25] : memref<1x1xf32, #tpu.memory_space<vmem>>, vector<1x1xf32>
      %53 = vector.shape_cast %52 : vector<1x1xf32> to vector<1x1x1xf32>
      %cst_26 = arith.constant dense<0.000000e+00> : vector<1xf32>
      %54 = vector.multi_reduction <add>, %53, %cst_26 [1, 2] : vector<1x1x1xf32> to vector<1xf32>
      %55 = vector.shape_cast %54 : vector<1xf32> to vector<1x1x1xf32>
      %56 = vector.extract %55[0, 0, 0] : f32 from vector<1x1x1xf32>
      %cst_27 = arith.constant 0.0073529412 : f32
      %57 = arith.mulf %56, %cst_27 : f32
      %c0_28 = arith.constant 0 : index
      %c0_29 = arith.constant 0 : index
      %58 = memref.load %arg6[%c0_28, %c0_29] : memref<1x1xf32, #tpu.memory_space<smem>>
      memref.store %57, %arg6[%c0_28, %c0_29] : memref<1x1xf32, #tpu.memory_space<smem>>
    } else {
    }
    return
  }
  func.func @transform_0(%arg0: i32) -> (i32, i32) {
    %c0_i32 = arith.constant 0 : i32
    %c0_i32_0 = arith.constant 0 : i32
    return %arg0, %c0_i32 : i32, i32
  }
  func.func @transform_1(%arg0: i32) -> (i32, i32) {
    %c0_i32 = arith.constant 0 : i32
    %c0_i32_0 = arith.constant 0 : i32
    return %arg0, %c0_i32 : i32, i32
  }
  func.func @transform_2(%arg0: i32) -> (i32, i32) {
    %c0_i32 = arith.constant 0 : i32
    %c0_i32_0 = arith.constant 0 : i32
    return %arg0, %c0_i32 : i32, i32
  }
  func.func @transform_3(%arg0: i32) -> (i32, i32) {
    %c0_i32 = arith.constant 0 : i32
    %c0_i32_0 = arith.constant 0 : i32
    return %arg0, %c0_i32 : i32, i32
  }
  func.func @transform_4(%arg0: i32) -> (i32, i32) {
    %c0_i32 = arith.constant 0 : i32
    %c0_i32_0 = arith.constant 0 : i32
    %c0_i32_1 = arith.constant 0 : i32
    return %c0_i32, %c0_i32_0 : i32, i32
  }
  func.func @transform_5(%arg0: i32) -> (i32, i32) {
    %c0_i32 = arith.constant 0 : i32
    %c0_i32_0 = arith.constant 0 : i32
    %c0_i32_1 = arith.constant 0 : i32
    return %c0_i32, %c0_i32_0 : i32, i32
  }
}

</mosaic_0001>

<bundles_post_ra>
// kernel: tpu_custom_call.1
= control target key start
LH: loop header
LB: loop body
LE: loop exit
PB: predicated region body
PF: predicated region fallthrough
CT: control target
= control target key end

     0   :  { %10 = vsyncpa [#allocation4], 0  ;;  %s308_s0 = inlined_call_operand.vmem [shape: f32[8,34], index: 0, kind: input, shape index: {}]   ;;  %s309_s1 = inlined_call_operand.hbm [shape: f32[8,34], index: 1, kind: input, shape index: {}]   ;;  %s310_s2 = inlined_call_operand.hbm [shape: f32[8,34], index: 2, kind: input, shape index: {}]   ;;  %s311_s3 = inlined_call_operand.vmem [shape: f32[8,1], index: 3, kind: input, shape index: {}]   ;;  %s312_s4 = inlined_call_operand.vmem [shape: f32[1,34], index: 4, kind: input, shape index: {}]   ;;  %s313_s5 = inlined_call_operand.hbm [shape: f32[1,1], index: 5, kind: output, shape index: {}]  }
   0x1   :  { %11 = vsyncpa [#allocation7], 0 }
   0x2   :  { %12 = vsyncpa [#allocation5], 0  ;;  %s20_s20 = sshll.u32 %s309_s1, 4  ;;  %s252_s21 = smov [#allocation3]   ;;  %s21_s20 = int_to_ptr.hbm [resolvable:$true] %s20_s20 }
   0x3   :  { %s22_s22 = sshll.u32 %s252_s21, 4  ;;  %s31_s25 = sshll.u32 %s310_s2, 4  ;;  %s23_s22 = int_to_ptr.vmem [resolvable:$true] %s22_s22  ;;  %s32_s25 = int_to_ptr.hbm [resolvable:$true] %s31_s25 }
   0x4   :  { %25 = dma.hbm_to_vmem [thread:$0]  %s21_s20, 128, %s23_s22, [#allocation4]  }
   0x5   :  { %s253_s26 = smov [#allocation6]  }
   0x6   :  { %s33_s27 = sshll.u32 %s253_s26, 4  ;;  %s34_s27 = int_to_ptr.vmem [resolvable:$true] %s33_s27 }
   0x7   :  { %36 = dma.hbm_to_vmem [thread:$0]  %s32_s25, 128, %s34_s27, [#allocation7]  }
   0x8   :  { %246 = dma.done.wait [#allocation4], 128  }
   0x9   :  { %247 = vsyncadd [#allocation4], 4294967168 }
   0xa   :  { %248 = dma.done.wait [#allocation7], 128  }
   0xb   :  { %249 = vsyncadd [#allocation7], 4294967168  ;;  %v254_v0 = vmov 0   ;;  %v58_v1 = vld [vmem:[%s311_s3] sm:$0xff]  ;;  %vm53_vm4 = vcmask 0   ;;  %v91_v13 = vld [vmem:[#allocation6] sm:$0xff] }
   0xc   :  { %178 = vset.pattern.permute.xlu0 %v254_v0  ;;  %v59_v2 = vadd.f32 1e-09, %v58_v1  ;;  %vm104_vm5 = vcmask 277504   ;;  %vm101_vm6 = vcmp.ne.f32.partialorder %v91_v13, 0.0  ;;  %v255_v14 = vmov 0.0   ;;  %v55_v17 = vld [vmem:[%s308_s0] sm:$0xff] }
   0xd   :  { %54 = vst.msk [vmem:[#allocation2] sm:$0x1] %vm53_vm4, %v255_v14  ;;  %v167_v15 = vsel %vm101_vm6, 1.0, %v255_v14  ;;  %v56_v18 = vld [vmem:[#allocation3] sm:$0xff]  ;;  %v179_v20 = vld [vmem:[%s312_s4] ss:$0 sm:$0xff] }
   0xe   :  { %180 = vrcp.f32 %v59_v2  ;;  %v71_v5 = vand.u32 2147483648, %v59_v2  ;;  %vm65_vm0 = vweird.f32 %v59_v2  ;;  %v69_v7 = vand.u32 2147483647, %v59_v2  ;;  %s256_s6 = smov 127   ;;  %s155_s8 = sshll.u32 %s313_s5, 4  ;;  %s156_s8 = int_to_ptr.hbm [resolvable:$true] %s155_s8 }
   0xf   :  { %v105_v16 = vsel %vm104_vm5, %v167_v15, 0.0  ;;  %v57_v19 = vsub.f32 %v55_v17, %v56_v18  ;;  %vm97_vm7 = vcmask 269312   ;;  %vm126_vm12 = vcmask 7168   ;;  %s257_s11 = smov [#allocation8]  }
  0x10   :  { %v72_v9 = vor.u32 1.1754944e-38, %v71_v5  ;;  %vm70_vm3 = vcmp.eq.f32.partialorder %v69_v7, 8.507059e+37  ;;  %106 = vadd.xlane.f32.xlu1 %v105_v16 }
  0x11   :  { %v74_v21 = vmul.f32 %v57_v19, %v57_v19 }
  0x13   :  { %v79_v22 = vmul.f32 %v179_v20, %v74_v21 }
  0x14   :  { %v181_v3 = vpop.eup %180  ;;  %v124_v56 = vld [vmem:[#allocation2] sm:$0x1] }
  0x15   :  { %v61_v4 = vmul.f32 %v181_v3, %v59_v2  ;;  %vm66_vm1 = vweird.f32 %v181_v3 }
  0x16   :  { %vm67_vm2 = vmor %vm65_vm0, %vm66_vm1 }
  0x17   :  { %v62_v6 = vsub.f32 1.0, %v61_v4 }
  0x19   :  { %v63_v8 = vmul.f32 %v181_v3, %v62_v6 }
  0x1b   :  { %v64_v10 = vadd.f32 %v181_v3, %v63_v8 }
  0x1d   :  { %v68_v11 = vsel %vm67_vm2, %v181_v3, %v64_v10 }
  0x1e   :  { %v73_v12 = vsel %vm70_vm3, %v72_v9, %v68_v11 }
  0x1f   :  { %82 = vperm.xlu0 %178, %v73_v12  }
  0x83   :  { %v107_v33 = vpop.xlane.xlu1 %106 }
  0x84   :  { %v108_v34 = vadd.f32 1e-09, %v107_v33 }
  0x86   :  { %vm114_vm8 = vweird.f32 %v108_v34  ;;  %v120_v39 = vand.u32 2147483648, %v108_v34  ;;  %v118_v41 = vand.u32 2147483647, %v108_v34 }
  0x88   :  { %v121_v42 = vor.u32 1.1754944e-38, %v120_v39  ;;  %vm119_vm11 = vcmp.eq.f32.partialorder %v118_v41, 8.507059e+37 }
  0x91   :  { %v83_v23 = vpop.permute.xlu0 %82 }
  0x92   :  { %v85_v24 = vmul.f32 %v83_v23, %v79_v22 }
  0x94   :  { %87 = vrot.lane.b32.xlu0 %v85_v24, %s256_s6 }
 0x106   :  { %v88_v25 = vpop.permute.xlu0 %87 }
 0x107   :  { %v90_v26 = vadd.f32 %v88_v25, %v85_v24 }
 0x109   :  { %v92_v27 = vsub.f32 0.0, %v90_v26 }
 0x10b   :  { %v93_v28 = vmul.f32 1.442695, %v92_v27 }
 0x10d   :  { %182 = vpow2.f32 %v93_v28 }
 0x10e   :  { %184 = vrcp.f32 %v108_v34 }
 0x113   :  { %v183_v29 = vpop.eup %182 }
 0x114   :  { %v95_v30 = vsub.f32 1.0, %v183_v29  ;;  %v185_v35 = vpop.eup %184 }
 0x115   :  { %v110_v36 = vmul.f32 %v185_v35, %v108_v34  ;;  %vm115_vm9 = vweird.f32 %v185_v35 }
 0x116   :  { %v96_v31 = vmul.f32 %v95_v30, %v91_v13  ;;  %vm116_vm10 = vmor %vm114_vm8, %vm115_vm9 }
 0x117   :  { %v111_v37 = vsub.f32 1.0, %v110_v36 }
 0x118   :  { %v98_v32 = vsel %vm97_vm7, %v96_v31, 0.0 }
 0x119   :  { %99 = vadd.xlane.f32.xlu1 %v98_v32  ;;  %v112_v38 = vmul.f32 %v185_v35, %v111_v37 }
 0x11b   :  { %v113_v40 = vadd.f32 %v185_v35, %v112_v38 }
 0x11d   :  { %v117_v43 = vsel %vm116_vm10, %v185_v35, %v113_v40 }
 0x11e   :  { %v122_v44 = vsel %vm119_vm11, %v121_v42, %v117_v43 }
 0x11f   :  { %v123_v45 = vmul.f32 17.0, %v122_v44 }
 0x18c   :  { %v100_v46 = vpop.xlane.xlu1 %99 }
 0x18d   :  { %v125_v47 = vmul.f32 %v123_v45, %v100_v46 }
 0x18f   :  { %v127_v48 = vsel %vm126_vm12, %v125_v47, 0.0 }
 0x190   :  { %128 = vadd.xlane.f32.xlu2 %v127_v48 }
 0x203   :  { %v129_v49 = vpop.xlane.xlu2 %128 }
 0x204   :  { %v130_v50 = vrot.slane %v129_v49, 4 }
 0x206   :  { %v131_v51 = vadd.f32 %v130_v50, %v129_v49 }
 0x208   :  { %v132_v52 = vrot.slane %v131_v51, 2 }
 0x20a   :  { %v133_v53 = vadd.f32 %v132_v52, %v131_v51 }
 0x20c   :  { %v134_v54 = vrot.slane %v133_v53, 1 }
 0x20e   :  { %v135_v55 = vadd.f32 %v134_v54, %v133_v53 }
 0x210   :  { %168 = vpush %v135_v55 }
 0x241   :  { %s169_s0 = spop %168 }
 0x242   :  { %v137_v57 = vstv %s169_s0 }
 0x243   :  { %v138_v58 = vadd.f32 %v137_v57, %v124_v56 }
 0x245   :  { %140 = vst.msk [vmem:[#allocation2] sm:$0x1] %vm53_vm4, %v138_v58 }
 0x24c   :  { %v144_v59 = vld [vmem:[#allocation2] sm:$0x1] }
 0x24d   :  { %170 = vpush %v144_v59 }
 0x27e   :  { %s171_s9 = spop %170 }
 0x27f   :  { %s147_s10 = smul.f32 0.007352941, %s171_s9 }
 0x281   :  { %149 = sst [smem:[#allocation8]] %s147_s10 }
 0x282   :  { %158 = dma.smem_to_hbm %s257_s11, 16, %s156_s8, [#allocation5]  }
 0x283   :  { %250 = dma.done.wait [#allocation5], 16  }
 0x284   :  { %251 = vsyncadd [#allocation5], 4294967280 }
 0x285   :  { %163 = sfence }
 0x286   :  { %164 = vsyncpa [#allocation4], 1 }
 0x287   :  { %165 = vsyncpa [#allocation7], 1 }
 0x288   :  { %166 = vsyncpa [#allocation5], 1 }

</bundles_post_ra>
